<compile_context>
chip_gen: v7x
topology: tpu7x:2x2x1
jax: 0.10.0
libtpu: 0.0.40
codegen_flags: <defaults>
</compile_context>

<pallas_src>
import jax
import jax.numpy as jnp
from jax.experimental import pallas as pl
from jax.experimental.pallas import tpu as pltpu


def _soft_kernel(x_ref, lam_ref, o_ref):
    # x_ref:   (row_block, l_block)  rows = flattened (batch, channel)
    # lam_ref: (row_block, 1)        per-row threshold, lane-broadcast in-block
    x = x_ref[...]
    lam = lam_ref[...]
    # Soft threshold via clip: exact match of the PyTorch mask form for lam >= 0,
    # propagates NaN; ~4 VALU ops/elem so the kernel stays HBM-bound on v7x.
    o_ref[...] = x - jnp.clip(x, -lam, lam)


def _round_up(n, m):
    return ((n + m - 1) // m) * m


def soft_forward(x, lambdas, *, target_block_bytes=4 * 1024 * 1024, donate_x=False):
    """x: (B, C, L), lambdas: (1, C, 1). Returns soft-thresholded x, same shape."""
    B, C, L = x.shape
    assert lambdas.shape == (1, C, 1)

    rows = B * C
    itemsize = x.dtype.itemsize
    x2 = x.reshape(rows, L)
    # Per-row thresholds: row r = (b, c) gets lambdas[0, c, 0]. Tiny (rows * 4 B).
    # NOTE: lam is cast to x.dtype; PyTorch would promote bf16 x to f32 here
    # (test / typical usage is f32, so this is exact).
    lam_rows = (
        jnp.broadcast_to(lambdas.reshape(1, C), (B, C))
        .reshape(rows, 1)
        .astype(x.dtype)
    )

    # ---------------- block-size selection ----------------
    MIN_ROWS = 16      # multiple of 16: clean sublane packing for f32 and bf16
    TARGET_STEPS = 8   # keep the grid long enough for v7x's 2 TCs + DMA overlap

    # Lane (L) tiling only kicks in for very long signals where even a 16-row
    # block would exceed the byte budget (guards v7x's 64 MiB VMEM ceiling).
    if L > 128 and MIN_ROWS * L * itemsize > target_block_bytes:
        l_block = max(128, (target_block_bytes // (MIN_ROWS * itemsize)) // 128 * 128)
    else:
        l_block = L  # full (lane-dense) last dim

    # Largest multiple-of-16 row block that fits the byte budget, capped so the
    # row axis has >= TARGET_STEPS grid steps whenever rows allow it.
    budget_rows = max(
        MIN_ROWS,
        (target_block_bytes // max(l_block * itemsize, 1)) // MIN_ROWS * MIN_ROWS,
    )
    steps_cap = max(MIN_ROWS, _round_up(pl.cdiv(rows, TARGET_STEPS), MIN_ROWS))
    row_block = min(rows, budget_rows, steps_cap)

    grid = (pl.cdiv(rows, row_block), pl.cdiv(L, l_block))

    # VMEM budget from the actual footprint: in + out double-buffered (~4x block)
    # + double-buffered lam column + slack. Clamp to a sane [4 MiB, 48 MiB] range.
    block_bytes = row_block * l_block * itemsize
    vmem_bytes = 4 * block_bytes + 4 * row_block * itemsize + (2 << 20)
    vmem_bytes = int(min(max(vmem_bytes, 4 << 20), 48 << 20))

    grid_spec = pltpu.PrefetchScalarGridSpec(
        num_scalar_prefetch=0,
        grid=grid,
        in_specs=[
            pl.BlockSpec((row_block, l_block), lambda r, l: (r, l)),
            pl.BlockSpec((row_block, 1), lambda r, l: (r, 0)),
        ],
        out_specs=pl.BlockSpec((row_block, l_block), lambda r, l: (r, l)),
    )

    out2 = pl.pallas_call(
        _soft_kernel,
        out_shape=jax.ShapeDtypeStruct((rows, L), x.dtype),
        grid_spec=grid_spec,
        compiler_params=pltpu.CompilerParams(
            dimension_semantics=("parallel", "parallel"),
            vmem_limit_bytes=vmem_bytes,
        ),
        # Footprint win when the caller can donate x (x dead after thresholding).
        input_output_aliases=({0: 0} if donate_x else {}),
    )(x2, lam_rows)

    return out2.reshape(B, C, L)


def _reference(x, lambdas):
    pos = (x > lambdas).astype(x.dtype)
    neg = (x < -lambdas).astype(x.dtype)
    return pos * (x - lambdas) + neg * (x + lambdas)


if __name__ == "__main__":
    init_lambdas = 0.001

    # --- Case 1: small module-consistent shapes (single-block path) ---
    B, C, L = 2, 4, 128
    lambdas = init_lambdas * jnp.ones((1, C, 1), dtype=jnp.float32)
    key = jax.random.PRNGKey(0)
    # scale inputs so a meaningful fraction falls inside [-lambda, lambda]
    x = 0.01 * jax.random.normal(key, (B, C, L), dtype=jnp.float32)

    out = jax.block_until_ready(soft_forward(x, lambdas))
    ref = _reference(x, lambdas)
    assert out.shape == x.shape
    assert jnp.allclose(out, ref, atol=1e-6), "mismatch vs reference"

    # --- Case 2: force the multi-block path (row tiling AND lane tiling) ---
    B2, C2, L2 = 2, 16, 256
    lambdas2 = init_lambdas * jnp.ones((1, C2, 1), dtype=jnp.float32)
    x2 = 0.01 * jax.random.normal(jax.random.PRNGKey(0), (B2, C2, L2), dtype=jnp.float32)
    # Tiny budget (16 rows x 128 lanes x 4 B) => grid = (2, 2), exercising both axes.
    out2 = jax.block_until_ready(
        soft_forward(x2, lambdas2, target_block_bytes=16 * 128 * 4)
    )
    ref2 = _reference(x2, lambdas2)
    assert jnp.allclose(out2, ref2, atol=1e-6), "mismatch vs reference (tiled path)"

    print("KERNEL_OK")
</pallas_src>

<mosaic_0001>
module attributes {stable_mosaic.version = 11 : i64} {
  func.func @_soft_kernel(%arg0: i32, %arg1: i32, %arg2: memref<8x128xf32, #tpu.memory_space<vmem>>, %arg3: memref<8x1xf32, #tpu.memory_space<vmem>>, %arg4: memref<8x128xf32, #tpu.memory_space<vmem>>) attributes {dimension_semantics = [#tpu.dimension_semantics<parallel>, #tpu.dimension_semantics<parallel>], iteration_bounds = array<i64: 1, 1>, scalar_prefetch = 0 : i64, scratch_operands = 0 : i64, tpu.core_type = #tpu.core_type<tc>, window_params = [{transform_indices = @transform_0, window_bounds = array<i64: 8, 128>}, {transform_indices = @transform_1, window_bounds = array<i64: 8, 1>}, {transform_indices = @transform_2, window_bounds = array<i64: 8, 128>}]} {
    %c0 = arith.constant 0 : index
    %c0_0 = arith.constant 0 : index
    %0 = vector.load %arg2[%c0, %c0_0] : memref<8x128xf32, #tpu.memory_space<vmem>>, vector<8x128xf32>
    %c0_1 = arith.constant 0 : index
    %c0_2 = arith.constant 0 : index
    %1 = vector.load %arg3[%c0_1, %c0_2] : memref<8x1xf32, #tpu.memory_space<vmem>>, vector<8x1xf32>
    %cst = arith.constant 0.000000e+00 : f32
    %2 = vector.broadcast %cst : f32 to vector<8x1xf32>
    %3 = arith.subf %2, %1 : vector<8x1xf32>
    %4 = vector.broadcast %3 : vector<8x1xf32> to vector<8x128xf32>
    %5 = arith.maximumf %4, %0 : vector<8x128xf32>
    %6 = vector.broadcast %1 : vector<8x1xf32> to vector<8x128xf32>
    %7 = arith.minimumf %6, %5 : vector<8x128xf32>
    %8 = arith.subf %0, %7 : vector<8x128xf32>
    %c0_3 = arith.constant 0 : index
    %c0_4 = arith.constant 0 : index
    %9 = vector.load %arg4[%c0_3, %c0_4] : memref<8x128xf32, #tpu.memory_space<vmem>>, vector<8x128xf32>
    tpu.vector_store %arg4[%c0_3, %c0_4], %8 {strides = array<i32>} : memref<8x128xf32, #tpu.memory_space<vmem>>, vector<8x128xf32>,
    return
  }
  func.func @transform_0(%arg0: i32, %arg1: i32) -> (i32, i32) {
    %c0_i32 = arith.constant 0 : i32
    return %arg0, %arg1 : i32, i32
  }
  func.func @transform_1(%arg0: i32, %arg1: i32) -> (i32, i32) {
    %c0_i32 = arith.constant 0 : i32
    %c0_i32_0 = arith.constant 0 : i32
    return %arg0, %c0_i32 : i32, i32
  }
  func.func @transform_2(%arg0: i32, %arg1: i32) -> (i32, i32) {
    %c0_i32 = arith.constant 0 : i32
    return %arg0, %arg1 : i32, i32
  }
}

</mosaic_0001>

<bundles_post_ra>
// kernel: tpu_custom_call.1
= control target key start
LH: loop header
LB: loop body
LE: loop exit
PB: predicated region body
PF: predicated region fallthrough
CT: control target
= control target key end

     0   :  { %s105_s0 = inlined_call_operand.vmem [shape: f32[8,128], index: 0, kind: input, shape index: {}]   ;;  %s106_s1 = inlined_call_operand.vmem [shape: f32[8,1], index: 1, kind: input, shape index: {}]   ;;  %s107_s2 = inlined_call_operand.hbm [shape: f32[8,128], index: 2, kind: output, shape index: {}]  }
   0x1   :  { %v13_v0 = vld [vmem:[%s106_s1] sm:$0xff] }
   0x2   :  { %7 = vsyncpa [#allocation3], 0  ;;  %v70_v1 = vmov 0   ;;  %v14_v2 = vsub.f32 0.0, %v13_v0  ;;  %v12_v4 = vld [vmem:[%s105_s0] sm:$0xff]  ;;  %s71_s13 = smov [#allocation2]  }
   0x3   :  { %45 = vset.pattern.permute.xlu0 %v70_v1  ;;  %s35_s14 = sshll.u32 %s71_s13, 4  ;;  %s36_s14 = int_to_ptr.vmem [resolvable:$true] %s35_s14 }
   0x4   :  { %17 = vperm.xlu0 %45, %v14_v2   ;;  %s46_s1 = scalar_lea.vmem %s36_s14, 128  ;;  %p51_p1 = scmp.lt.s32.totalorder %s36_s14, %s36_s14 }
   0x5   :  { %p47_p0 = scmp.ne.s32.totalorder %s36_s14, %s46_s1  ;;  %p52_p2 = scmp.lt.s32.totalorder %s46_s1, %s46_s1 }
   0x7   :  { %p53_p3 = por %p52_p2, %p51_p1 }
   0x8   :  { %23 = vperm.xlu0 %45, %v13_v0  }
   0x9   :  { %p54_p4 = pnand %p53_p3, %p47_p0 }
  0x83   :  { %v18_v3 = vpop.permute.xlu0 %17 }
  0x84   :  { %v20_v5 = vmax.f32 %v18_v3, %v12_v4 }
  0x87   :  { %v24_v6 = vpop.permute.xlu0 %23 }
  0x88   :  { %v26_v7 = vmin.f32 %v24_v6, %v20_v5 }
  0x8a   :  { %v27_v8 = vsub.f32 %v12_v4, %v26_v7 }
  0x8c   :  { %28 = vst [vmem:[#allocation2] sm:$0xff] %v27_v8 }
  0x8d   :  { %57 = shalt.err (!%p54_p4)
}
  0x8e   :  { %s58_s17 = scalar_lea.hbm %s107_s2, 128 }
  0x8f   :  { %p59_p5 = scmp.ne.s32.totalorder %s107_s2, %s58_s17  ;;  %p62_p6 = scmp.lt.u32.totalorder %s58_s17, %s107_s2 }
  0x91   :  { %p64_p7 = pnand %p62_p6, %p59_p5 }
  0x93   :  { %67 = shalt.err (!%p64_p7)
}
  0x94   :  { %38 = dma.vmem_to_hbm [thread:$0]  %s36_s14, 128, %s107_s2, [#allocation3]  }
  0x95   :  { %68 = dma.done.wait [#allocation3], 128  }
  0x96   :  { %69 = vsyncadd [#allocation3], 4294967168 }
  0x97   :  { %42 = vsyncpa [#allocation3], 1 }

</bundles_post_ra>
